<compile_context>
chip_gen: v7x
topology: tpu7x:2x2x1
jax: 0.10.0
libtpu: 0.0.40
codegen_flags: <defaults>
</compile_context>

<pallas_src>
import jax
import jax.numpy as jnp
from jax.experimental import pallas as pl
from jax.experimental.pallas import tpu as pltpu

H = 128  # padded hidden width (TPU lane count); fc1/fc2 are zero-padded to this.


def _round_up(x, m):
    return ((x + m - 1) // m) * m


# ----------------------------------------------------------------------------- kernel
def qnetwork_kernel(x_ref, w1_ref, w2_ref, w3_ref, b_ref, o_ref):
    b = b_ref[...]                                            # (8, 128) f32 packed biases

    x = x_ref[...]                                            # (TB, S) activation tile
    h1 = jnp.dot(x, w1_ref[...], preferred_element_type=jnp.float32)
    h1 = jnp.maximum(h1 + b[0:1, :], 0.0)                     # (TB, 128) lane-dense, f32

    h2 = jnp.dot(h1, w2_ref[...], preferred_element_type=jnp.float32)
    h2 = jnp.maximum(h2 + b[1:2, :], 0.0)                     # (TB, 128) lane-dense, f32

    a = o_ref.shape[1]                                        # action_size (narrow output)
    o = jnp.dot(h2, w3_ref[...], preferred_element_type=jnp.float32)
    o_ref[...] = (o + b[2:3, :a]).astype(o_ref.dtype)         # (TB, A) narrow store


# ------------------------------------------------------------------------- params prep
def init_params(key, state_size, action_size, fc1_units=64, fc2_units=32):
    """nn.Linear default init: U(-1/sqrt(fan_in), 1/sqrt(fan_in)); weights as (in, out)."""
    def linear(k, fan_in, fan_out):
        kw, kb = jax.random.split(k)
        bound = 1.0 / jnp.sqrt(fan_in)
        w = jax.random.uniform(kw, (fan_in, fan_out), jnp.float32, -bound, bound)
        b = jax.random.uniform(kb, (1, fan_out), jnp.float32, -bound, bound)
        return w, b

    k1, k2, k3 = jax.random.split(key, 3)
    w1, b1 = linear(k1, state_size, fc1_units)
    w2, b2 = linear(k2, fc1_units, fc2_units)
    w3, b3 = linear(k3, fc2_units, action_size)
    return {"w1": w1, "b1": b1, "w2": w2, "b2": b2, "w3": w3, "b3": b3}


def pack_params(params):
    """Zero-pad hidden dims to 128 lanes and pack the 3 biases into one (8, 128) buffer.

    Padded weight columns/rows and padded bias lanes are exactly zero, so padded hidden
    lanes stay exactly zero through bias-add + ReLU -> results match the unpadded math.
    """
    w1, w2, w3 = params["w1"], params["w2"], params["w3"]
    S, fc1 = w1.shape
    fc2, A = w3.shape
    assert fc1 <= H and fc2 <= H and A <= H

    w1p = jnp.zeros((S, H), jnp.float32).at[:, :fc1].set(w1)
    w2p = jnp.zeros((H, H), jnp.float32).at[:fc1, :fc2].set(w2)
    w3p = jnp.zeros((H, A), jnp.float32).at[:fc2, :].set(w3)

    bpk = jnp.zeros((8, H), jnp.float32)
    bpk = bpk.at[0, :fc1].set(params["b1"].reshape(-1))
    bpk = bpk.at[1, :fc2].set(params["b2"].reshape(-1))
    bpk = bpk.at[2, :A].set(params["b3"].reshape(-1))
    return {"w1": w1p, "w2": w2p, "w3": w3p, "b": bpk}


# ---------------------------------------------------------------------------- wrappers
def qnetwork_forward(state, packed, *, block_b=4096, io_dtype=jnp.float32):
    """Pallas forward. state: (B, state_size). Returns (B, action_size) f32.

    io_dtype controls only the HBM activation stream (input tile / output tile);
    all matmul accumulation and bias-add/ReLU stay in f32.
    """
    B, S = state.shape
    w1, w2, w3, b = packed["w1"], packed["w2"], packed["w3"], packed["b"]
    A = w3.shape[1]
    assert w1.shape[0] == S

    x = state.astype(io_dtype)

    # Big tiles amortize the ~0.35us/step pipeline overhead; the cdiv(B, 2) clamp keeps
    # the grid at >= 2 steps so the "parallel" axis shards across v7x's two TensorCores
    # (no-op on single-TC v5e/v6e).
    tb = min(_round_up(block_b, 8), _round_up(pl.cdiv(B, 2), 8))
    tb = max(tb, 8)
    Bp = _round_up(B, tb)
    if Bp != B:
        x = jnp.pad(x, ((0, Bp - B), (0, 0)))
    grid = (Bp // tb,)

    io_itemsize = jnp.dtype(io_dtype).itemsize
    flops = 2 * Bp * (S * H + H * H + H * A)
    bytes_accessed = (Bp * S * io_itemsize + Bp * A * io_itemsize
                      + (w1.size + w2.size + w3.size + b.size) * 4)

    out = pl.pallas_call(
        qnetwork_kernel,
        out_shape=jax.ShapeDtypeStruct((Bp, A), io_dtype),
        grid=grid,
        in_specs=[
            pl.BlockSpec((tb, S), lambda i: (i, 0)),      # activation stream (tiled, double-buffered)
            pl.BlockSpec((S, H), lambda i: (0, 0)),       # weights/biases: VMEM-resident
            pl.BlockSpec((H, H), lambda i: (0, 0)),
            pl.BlockSpec((H, A), lambda i: (0, 0)),
            pl.BlockSpec((8, H), lambda i: (0, 0)),       # packed biases
        ],
        out_specs=pl.BlockSpec((tb, A), lambda i: (i, 0)),  # narrow (action_size-wide) output
        compiler_params=pltpu.CompilerParams(
            dimension_semantics=("parallel",),            # dual-TC sharding on v7x
            vmem_limit_bytes=32 * 1024 * 1024,
        ),
        cost_estimate=pl.CostEstimate(
            flops=flops, transcendentals=0, bytes_accessed=bytes_accessed),
    )(x, w1, w2, w3, b)

    return out[:B].astype(jnp.float32)


def qnetwork_reference(state, params):
    """Plain-XLA forward (small-batch fallback and correctness reference)."""
    h1 = jnp.maximum(state @ params["w1"] + params["b1"], 0.0)
    h2 = jnp.maximum(h1 @ params["w2"] + params["b2"], 0.0)
    return h2 @ params["w3"] + params["b3"]


def qnetwork_apply(state, params, packed, *, min_pallas_batch=2048):
    """Dispatch: below a few thousand rows the fused XLA path wins (no custom-call /
    grid-step fixed cost); re-benchmark the crossover per TPU generation with xprof."""
    if state.shape[0] < min_pallas_batch:
        return qnetwork_reference(state, params)
    return qnetwork_forward(state, packed)


# -------------------------------------------------------------------------------- test
if __name__ == "__main__":
    key = jax.random.PRNGKey(0)
    k_params, k_small, k_big = jax.random.split(key, 3)

    state_size, action_size = 8, 4
    params = init_params(k_params, state_size, action_size)
    packed = pack_params(params)

    # --- small-batch check (B=2), kernel path forced ---
    state_small = jax.random.normal(k_small, (2, state_size), jnp.float32)
    out_small = jax.block_until_ready(qnetwork_forward(state_small, packed))
    ref_small = qnetwork_reference(state_small, params)
    assert out_small.shape == (2, action_size)
    assert jnp.allclose(out_small, ref_small, atol=1e-5, rtol=1e-5)

    # --- larger batch: exercises the big default tile + >=2-step parallel grid ---
    state_big = jax.random.normal(k_big, (4096, state_size), jnp.float32)
    out_big = jax.block_until_ready(qnetwork_forward(state_big, packed))
    ref_big = qnetwork_reference(state_big, params)
    assert out_big.shape == (4096, action_size)
    assert jnp.allclose(out_big, ref_big, atol=1e-4, rtol=1e-4)

    # --- bf16 activation-stream path (halves per-row HBM bytes; weights stay f32,
    #     accumulation/bias-add/ReLU stay f32). Reference uses the same bf16-rounded
    #     input; remaining delta is the bf16 output store + matmul rounding. ---
    state_big_bf16_rounded = state_big.astype(jnp.bfloat16).astype(jnp.float32)
    out_bf16 = jax.block_until_ready(
        qnetwork_forward(state_big, packed, io_dtype=jnp.bfloat16))
    ref_bf16 = qnetwork_reference(state_big_bf16_rounded, params)
    assert jnp.allclose(out_bf16, ref_bf16, atol=5e-2, rtol=5e-2)

    # --- dispatch helper sanity (XLA fallback branch) ---
    out_disp = jax.block_until_ready(qnetwork_apply(state_small, params, packed))
    assert jnp.allclose(out_disp, ref_small, atol=1e-5, rtol=1e-5)

    print("KERNEL_OK")
</pallas_src>

<mosaic_0001>
module attributes {stable_mosaic.version = 11 : i64} {
  func.func @qnetwork_kernel(%arg0: i32, %arg1: memref<8x8xf32, #tpu.memory_space<vmem>>, %arg2: memref<8x128xf32, #tpu.memory_space<vmem>>, %arg3: memref<128x128xf32, #tpu.memory_space<vmem>>, %arg4: memref<128x4xf32, #tpu.memory_space<vmem>>, %arg5: memref<8x128xf32, #tpu.memory_space<vmem>>, %arg6: memref<8x4xf32, #tpu.memory_space<vmem>>) attributes {dimension_semantics = [#tpu.dimension_semantics<parallel>], iteration_bounds = array<i64: 1>, scalar_prefetch = 0 : i64, scratch_operands = 0 : i64, tpu.core_type = #tpu.core_type<tc>, window_params = [{transform_indices = @transform_0, window_bounds = array<i64: 8, 8>}, {pipeline_mode = #tpu.pipeline_mode<synchronous>, transform_indices = @transform_1, window_bounds = array<i64: 8, 128>}, {pipeline_mode = #tpu.pipeline_mode<synchronous>, transform_indices = @transform_2, window_bounds = array<i64: 128, 128>}, {pipeline_mode = #tpu.pipeline_mode<synchronous>, transform_indices = @transform_3, window_bounds = array<i64: 128, 4>}, {pipeline_mode = #tpu.pipeline_mode<synchronous>, transform_indices = @transform_4, window_bounds = array<i64: 8, 128>}, {transform_indices = @transform_5, window_bounds = array<i64: 8, 4>}]} {
    %c0 = arith.constant 0 : index
    %c0_0 = arith.constant 0 : index
    %0 = vector.load %arg5[%c0, %c0_0] : memref<8x128xf32, #tpu.memory_space<vmem>>, vector<8x128xf32>
    %c0_1 = arith.constant 0 : index
    %c0_2 = arith.constant 0 : index
    %1 = vector.load %arg1[%c0_1, %c0_2] : memref<8x8xf32, #tpu.memory_space<vmem>>, vector<8x8xf32>
    %c0_3 = arith.constant 0 : index
    %c0_4 = arith.constant 0 : index
    %2 = vector.load %arg2[%c0_3, %c0_4] : memref<8x128xf32, #tpu.memory_space<vmem>>, vector<8x128xf32>
    %cst = arith.constant dense<0.000000e+00> : vector<8x128xf32>
    %3 = tpu.matmul %1, %2, %cst {dimension_numbers = #tpu.dot_dimension_numbers<[1], [0], [0], [1], [0, 0, 1, 1], [], []>} : vector<8x8xf32>, vector<8x128xf32>, vector<8x128xf32> -> vector<8x128xf32>
    %4 = vector.extract_strided_slice %0 {offsets = [0, 0], sizes = [1, 128], strides = [1, 1]} : vector<8x128xf32> to vector<1x128xf32>
    %5 = vector.broadcast %4 : vector<1x128xf32> to vector<8x128xf32>
    %6 = arith.addf %3, %5 : vector<8x128xf32>
    %cst_5 = arith.constant 0.000000e+00 : f32
    %7 = vector.broadcast %cst_5 : f32 to vector<8x128xf32>
    %8 = arith.maximumf %6, %7 : vector<8x128xf32>
    %c0_6 = arith.constant 0 : index
    %c0_7 = arith.constant 0 : index
    %9 = vector.load %arg3[%c0_6, %c0_7] : memref<128x128xf32, #tpu.memory_space<vmem>>, vector<128x128xf32>
    %cst_8 = arith.constant dense<0.000000e+00> : vector<8x128xf32>
    %10 = tpu.matmul %8, %9, %cst_8 {dimension_numbers = #tpu.dot_dimension_numbers<[1], [0], [0], [1], [0, 0, 1, 1], [], []>} : vector<8x128xf32>, vector<128x128xf32>, vector<8x128xf32> -> vector<8x128xf32>
    %11 = vector.extract_strided_slice %0 {offsets = [1, 0], sizes = [1, 128], strides = [1, 1]} : vector<8x128xf32> to vector<1x128xf32>
    %12 = vector.broadcast %11 : vector<1x128xf32> to vector<8x128xf32>
    %13 = arith.addf %10, %12 : vector<8x128xf32>
    %cst_9 = arith.constant 0.000000e+00 : f32
    %14 = vector.broadcast %cst_9 : f32 to vector<8x128xf32>
    %15 = arith.maximumf %13, %14 : vector<8x128xf32>
    %c0_10 = arith.constant 0 : index
    %c0_11 = arith.constant 0 : index
    %16 = vector.load %arg4[%c0_10, %c0_11] : memref<128x4xf32, #tpu.memory_space<vmem>>, vector<128x4xf32>
    %cst_12 = arith.constant dense<0.000000e+00> : vector<8x4xf32>
    %17 = tpu.matmul %15, %16, %cst_12 {dimension_numbers = #tpu.dot_dimension_numbers<[1], [0], [0], [1], [0, 0, 1, 1], [], []>} : vector<8x128xf32>, vector<128x4xf32>, vector<8x4xf32> -> vector<8x4xf32>
    %18 = vector.extract_strided_slice %0 {offsets = [2, 0], sizes = [1, 4], strides = [1, 1]} : vector<8x128xf32> to vector<1x4xf32>
    %19 = vector.broadcast %18 : vector<1x4xf32> to vector<8x4xf32>
    %20 = arith.addf %17, %19 : vector<8x4xf32>
    %c0_13 = arith.constant 0 : index
    %c0_14 = arith.constant 0 : index
    %21 = vector.load %arg6[%c0_13, %c0_14] : memref<8x4xf32, #tpu.memory_space<vmem>>, vector<8x4xf32>
    tpu.vector_store %arg6[%c0_13, %c0_14], %20 {strides = array<i32>} : memref<8x4xf32, #tpu.memory_space<vmem>>, vector<8x4xf32>,
    return
  }
  func.func @transform_0(%arg0: i32) -> (i32, i32) {
    %c0_i32 = arith.constant 0 : i32
    %c0_i32_0 = arith.constant 0 : i32
    return %arg0, %c0_i32 : i32, i32
  }
  func.func @transform_1(%arg0: i32) -> (i32, i32) {
    %c0_i32 = arith.constant 0 : i32
    %c0_i32_0 = arith.constant 0 : i32
    %c0_i32_1 = arith.constant 0 : i32
    return %c0_i32, %c0_i32_0 : i32, i32
  }
  func.func @transform_2(%arg0: i32) -> (i32, i32) {
    %c0_i32 = arith.constant 0 : i32
    %c0_i32_0 = arith.constant 0 : i32
    %c0_i32_1 = arith.constant 0 : i32
    return %c0_i32, %c0_i32_0 : i32, i32
  }
  func.func @transform_3(%arg0: i32) -> (i32, i32) {
    %c0_i32 = arith.constant 0 : i32
    %c0_i32_0 = arith.constant 0 : i32
    %c0_i32_1 = arith.constant 0 : i32
    return %c0_i32, %c0_i32_0 : i32, i32
  }
  func.func @transform_4(%arg0: i32) -> (i32, i32) {
    %c0_i32 = arith.constant 0 : i32
    %c0_i32_0 = arith.constant 0 : i32
    %c0_i32_1 = arith.constant 0 : i32
    return %c0_i32, %c0_i32_0 : i32, i32
  }
  func.func @transform_5(%arg0: i32) -> (i32, i32) {
    %c0_i32 = arith.constant 0 : i32
    %c0_i32_0 = arith.constant 0 : i32
    return %arg0, %c0_i32 : i32, i32
  }
}

</mosaic_0001>

<bundles_post_ra>
// kernel: tpu_custom_call.1
= control target key start
LH: loop header
LB: loop body
LE: loop exit
PB: predicated region body
PF: predicated region fallthrough
CT: control target
= control target key end

     0   :  { %10 = vsyncpa [#allocation3], 0  ;;  %s490_s18 = smov [#allocation2]   ;;  %s660_s0 = inlined_call_operand.vmem [shape: f32[8,8], index: 0, kind: input, shape index: {}]   ;;  %s661_s1 = inlined_call_operand.hbm [shape: f32[8,128], index: 1, kind: input, shape index: {}]   ;;  %s662_s2 = inlined_call_operand.vmem [shape: f32[128,128], index: 2, kind: input, shape index: {}]   ;;  %s663_s3 = inlined_call_operand.vmem [shape: f32[128,4], index: 3, kind: input, shape index: {}]   ;;  %s664_s4 = inlined_call_operand.vmem [shape: f32[8,128], index: 4, kind: input, shape index: {}]   ;;  %s665_s5 = inlined_call_operand.vmem [shape: f32[8,4], index: 5, kind: output, shape index: {}]  }
   0x1   :  { %s19_s19 = sshll.u32 %s490_s18, 4  ;;  %s466_s22 = scalar_lea.hbm %s661_s1, 128  ;;  %s20_s19 = int_to_ptr.vmem [resolvable:$true] %s19_s19 }
   0x2   :  { %p467_p0 = scmp.ne.s32.totalorder %s661_s1, %s466_s22  ;;  %p470_p1 = scmp.lt.u32.totalorder %s466_s22, %s661_s1 }
   0x4   :  { %p472_p2 = pnand %p470_p1, %p467_p0 }
   0x6   :  { %475 = shalt.err (!%p472_p2)
}
   0x7   :  { %s476_s27 = scalar_lea.vmem %s20_s19, 128  ;;  %p481_p4 = scmp.lt.s32.totalorder %s20_s19, %s20_s19 }
   0x8   :  { %p477_p3 = scmp.ne.s32.totalorder %s20_s19, %s476_s27  ;;  %p482_p5 = scmp.lt.s32.totalorder %s476_s27, %s476_s27 }
   0xa   :  { %p483_p6 = por %p482_p5, %p481_p4 }
   0xc   :  { %p484_p7 = pnand %p483_p6, %p477_p3 }
   0xe   :  { %487 = shalt.err (!%p484_p7)
}
   0xf   :  { %22 = dma.hbm_to_vmem [thread:$0]  %s661_s1, 128, %s20_s19, [#allocation3]  }
  0x10   :  { %488 = dma.done.wait [#allocation3], 128  }
  0x11   :  { %489 = vsyncadd [#allocation3], 4294967168  ;;  %v491_v0 = vmov 0.0   ;;  %vm492_vm0 = vmmov 0   ;;  %v493_v1 = vmov 0.0|0.0   ;;  %vm39_vm1 = vcmask 64512  }
  0x12   :  { %339 = vmatprep.subr.mxu0 %v491_v0  ;;  %341 = vmatprep.mubr.msk.f32.mxu0 %vm492_vm0, %v491_v0  ;;  %v34_v2 = vld [vmem:[#allocation2] sm:$0xff]  ;;  %v115_v5 = vld [vmem:[%s662_s2 + $0x8] sm:$0xff]  ;;  %v116_v6 = vld [vmem:[%s662_s2 + $0x10] sm:$0xff]  ;;  %v35_v49 = vlaneseq  ;;  %vm295_vm2 = vcmask 31744  }
  0x13   :  { %414 = vmatprep.subr.bf16.mxu1 %v493_v1  ;;  %376 = vmatprep.mubr.msk.f32.mxu1 %vm492_vm0, %v491_v0  ;;  %v33_v3 = vld [vmem:[%s660_s0] sm:$0xff]  ;;  %v117_v7 = vld [vmem:[%s662_s2 + $0x18] sm:$0xff]  ;;  %v119_v11 = vld [vmem:[%s662_s2 + $0x28] sm:$0xff] }
  0x14   :  { %v114_v4 = vld [vmem:[%s662_s2] sm:$0xff]  ;;  %340 = vmatpush3.msra.mxu0 %v34_v2  ;;  %v418_v9 = vpack.c.bf16 %v117_v7, %v116_v6  ;;  %v120_v13 = vld [vmem:[%s662_s2 + $0x30] sm:$0xff]  ;;  %v121_v14 = vld [vmem:[%s662_s2 + $0x38] sm:$0xff]  ;;  %v36_v50 = vshrl.u32 %v35_v49, 7 }
  0x15   :  { %342 = vmatmul.mubr.msk.f32.vlgmr.msra.gmra.mrb[0].mxu0 %vm39_vm1, %v33_v3  ;;  %v415_v8 = vpack.c.bf16 %v115_v5, %v114_v4  ;;  %438 = vmatprep.subr.bf16.mxu0 %v493_v1  ;;  %v118_v10 = vld [vmem:[%s662_s2 + $0x20] sm:$0xff]  ;;  %v424_v15 = vpack.c.bf16 %v121_v14, %v120_v13  ;;  %v123_v17 = vld [vmem:[%s662_s2 + $0x48] sm:$0xff]  ;;  %v124_v19 = vld [vmem:[%s662_s2 + $0x50] sm:$0xff] }
  0x16   :  { %411 = vmatprep.mubr.msk.f32.mxu0 %vm492_vm0, %v491_v0  ;;  %v421_v12 = vpack.c.bf16 %v119_v11, %v118_v10  ;;  %v122_v16 = vld [vmem:[%s662_s2 + $0x40] sm:$0xff]  ;;  %v125_v20 = vld [vmem:[%s662_s2 + $0x58] sm:$0xff]  ;;  %v127_v23 = vld [vmem:[%s662_s2 + $0x68] sm:$0xff]  ;;  %v37_v51 = vsub.s32 0, %v36_v50  ;;  %v132_v61 = vsub.s32 1, %v36_v50  ;;  %v223_v3 = vsub.s32 2, %v36_v50 }
  0x17   :  { %416 = vmatpush3.bf16.msra.mxu1 %v415_v8  ;;  %v427_v18 = vpack.c.bf16 %v123_v17, %v122_v16  ;;  %v430_v21 = vpack.c.bf16 %v125_v20, %v124_v19  ;;  %v126_v22 = vld [vmem:[%s662_s2 + $0x60] sm:$0xff]  ;;  %v128_v25 = vld [vmem:[%s662_s2 + $0x70] sm:$0xff]  ;;  %v129_v26 = vld [vmem:[%s662_s2 + $0x78] sm:$0xff] }
  0x18   :  { %417 = vmatprep.subr.bf16.mxu1 %v493_v1  ;;  %v433_v24 = vpack.c.bf16 %v127_v23, %v126_v22  ;;  %v436_v27 = vpack.c.bf16 %v129_v26, %v128_v25  ;;  %v205_v28 = vld [vmem:[%s663_s3] sm:$0xff]  ;;  %v206_v29 = vld [vmem:[%s663_s3 + $0x8] sm:$0xff]  ;;  %v207_v30 = vld [vmem:[%s663_s3 + $0x10] sm:$0xff] }
  0x19   :  { %v439_v31 = vpack.c.bf16 %v206_v29, %v205_v28  ;;  %v208_v32 = vld [vmem:[%s663_s3 + $0x18] sm:$0xff]  ;;  %v209_v34 = vld [vmem:[%s663_s3 + $0x20] sm:$0xff]  ;;  %v210_v35 = vld [vmem:[%s663_s3 + $0x28] sm:$0xff] }
  0x1a   :  { %v442_v33 = vpack.c.bf16 %v208_v32, %v207_v30  ;;  %v445_v36 = vpack.c.bf16 %v210_v35, %v209_v34  ;;  %v211_v37 = vld [vmem:[%s663_s3 + $0x30] sm:$0xff]  ;;  %v212_v38 = vld [vmem:[%s663_s3 + $0x38] sm:$0xff]  ;;  %v213_v40 = vld [vmem:[%s663_s3 + $0x40] sm:$0xff] }
  0x1b   :  { %419 = vmatpush3.bf16.msra.mxu1 %v418_v9  ;;  %440 = vmatpush3.bf16.msra.mxu0 %v439_v31  ;;  %v448_v39 = vpack.c.bf16 %v212_v38, %v211_v37  ;;  %v214_v41 = vld [vmem:[%s663_s3 + $0x48] sm:$0xff]  ;;  %v215_v43 = vld [vmem:[%s663_s3 + $0x50] sm:$0xff]  ;;  %v216_v44 = vld [vmem:[%s663_s3 + $0x58] sm:$0xff] }
  0x1c   :  { %420 = vmatprep.subr.bf16.mxu1 %v493_v1  ;;  %441 = vmatprep.subr.bf16.mxu0 %v493_v1  ;;  %v451_v42 = vpack.c.bf16 %v214_v41, %v213_v40  ;;  %v454_v45 = vpack.c.bf16 %v216_v44, %v215_v43  ;;  %v217_v46 = vld [vmem:[%s663_s3 + $0x60] sm:$0xff]  ;;  %v218_v47 = vld [vmem:[%s663_s3 + $0x68] sm:$0xff]  ;;  %v219_v58 = vld [vmem:[%s663_s3 + $0x70] sm:$0xff] }
  0x1d   :  { %v457_v48 = vpack.c.bf16 %v218_v47, %v217_v46  ;;  %v32_v52 = vld [vmem:[%s664_s4] sm:$0xff]  ;;  %v220_v59 = vld [vmem:[%s663_s3 + $0x78] sm:$0xff] }
  0x1e   :  { %v38_v53 = vrot.slane %v32_v52, %v37_v51  ;;  %v460_v60 = vpack.c.bf16 %v220_v59, %v219_v58  ;;  %v133_v62 = vrot.slane %v32_v52, %v132_v61  ;;  %v224_v4 = vrot.slane %v32_v52, %v223_v3 }
  0x1f   :  { %422 = vmatpush3.bf16.msra.mxu1 %v421_v12  ;;  %443 = vmatpush3.bf16.msra.mxu0 %v442_v33 }
  0x20   :  { %423 = vmatprep.subr.bf16.mxu1 %v493_v1  ;;  %444 = vmatprep.subr.bf16.mxu0 %v493_v1 }
  0x23   :  { %425 = vmatpush3.bf16.msra.mxu1 %v424_v15  ;;  %446 = vmatpush3.bf16.msra.mxu0 %v445_v36 }
  0x24   :  { %426 = vmatprep.subr.bf16.mxu1 %v493_v1  ;;  %447 = vmatprep.subr.bf16.mxu0 %v493_v1 }
  0x27   :  { %428 = vmatpush3.bf16.msra.mxu1 %v427_v18  ;;  %449 = vmatpush3.bf16.msra.mxu0 %v448_v39 }
  0x28   :  { %429 = vmatprep.subr.bf16.mxu1 %v493_v1  ;;  %450 = vmatprep.subr.bf16.mxu0 %v493_v1 }
  0x2b   :  { %431 = vmatpush3.bf16.msra.mxu1 %v430_v21  ;;  %452 = vmatpush3.bf16.msra.mxu0 %v451_v42 }
  0x2c   :  { %432 = vmatprep.subr.bf16.mxu1 %v493_v1  ;;  %453 = vmatprep.subr.bf16.mxu0 %v493_v1 }
  0x2f   :  { %434 = vmatpush3.bf16.msra.mxu1 %v433_v24  ;;  %455 = vmatpush3.bf16.msra.mxu0 %v454_v45 }
  0x30   :  { %435 = vmatprep.subr.bf16.mxu1 %v493_v1  ;;  %456 = vmatprep.subr.bf16.mxu0 %v493_v1 }
  0x33   :  { %437 = vmatpush3.bf16.msra.mxu1 %v436_v27  ;;  %458 = vmatpush3.bf16.msra.mxu0 %v457_v48 }
  0x34   :  { %459 = vmatprep.subr.bf16.mxu0 %v493_v1 }
  0x37   :  { %461 = vmatpush3.bf16.msra.mxu0 %v460_v60 }
  0xe8   :  { %v109_v54 = vpop.f32.mrb[0].mxu0 }
  0xe9   :  { %v110_v55 = vadd.f32 %v109_v54, %v38_v53  ;;  %v343_v56 = vpop.f32.mrb[1].mxu0 }
  0xeb   :  { %v113_v57 = vmax.f32 %v110_v55, 0.0 }
  0xed   :  { %377 = vmatmul.mubr.f32.vlgmr.msra.gmra.mrb[0].mxu1 %v113_v57 }
 0x1c0   :  { %v200_v63 = vpop.f32.mrb[0].mxu1 }
 0x1c1   :  { %v201_v0 = vadd.f32 %v200_v63, %v133_v62  ;;  %v378_v1 = vpop.f32.mrb[1].mxu1 }
 0x1c3   :  { %v204_v2 = vmax.f32 %v201_v0, 0.0 }
 0x1c5   :  { %412 = vmatmul.mubr.f32.vlgmr.msra.gmra.mrb[2].mxu0 %v204_v2 }
 0x298   :  { %v291_v5 = vpop.f32.mrb[2].mxu0 }
 0x299   :  { %v292_v6 = vadd.f32 %v291_v5, %v224_v4  ;;  %v413_v7 = vpop.f32.mrb[3].mxu0 }
 0x29b   :  { %296 = vst.msk [vmem:[%s665_s5] sm:$0xff] %vm295_vm2, %v292_v6 }
 0x29c   :  { %301 = vsyncpa [#allocation3], 1 }

</bundles_post_ra>
